<compile_context>
chip_gen: v7x
topology: tpu7x:2x2x1
jax: 0.10.0
libtpu: 0.0.40
codegen_flags: <defaults>
</compile_context>

<pallas_src>
import math

import jax
import jax.numpy as jnp
from jax import lax
from jax.experimental import pallas as pl
from jax.experimental.pallas import tpu as pltpu

EPS = 1e-5                               # PyTorch nn.LayerNorm default eps
_LANE = 128
_TARGET_OUT_BYTES = 2 * 1024 * 1024      # ~2 MiB of output per grid step
_VMEM_TILE_BUDGET = 24 * 1024 * 1024     # double-buffered tile budget (v7x-safe)
_MIN_STEP_ROWS = 1024                    # don't split into steps smaller than this


def _round_up(v, m):
    return ((v + m - 1) // m) * m


def _cdiv(a, b):
    return -(-a // b)


def _make_cluster_kernel(has_mask):
    """Kernel factory specialized on mask presence."""

    def kernel(*refs):
        if has_mask:
            x_ref, mask_ref, w_ref, p_ref, out_ref = refs
        else:
            x_ref, w_ref, p_ref, out_ref = refs
        tn, l, two_h = out_ref.shape
        h_dim = two_h // 2

        # One MXU matmul for all TN clusters in this grid step.
        h = jnp.dot(x_ref[...], w_ref[...],
                    preferred_element_type=jnp.float32)       # [TN*L, H]
        p = p_ref[...]                        # (3, H): rows = bias, gamma, beta
        h = h + p[0:1, :]

        # LayerNorm over the hidden (last) axis + affine + ReLU.
        mean = jnp.mean(h, axis=-1, keepdims=True)             # [TN*L, 1]
        var = jnp.mean(jnp.square(h - mean), axis=-1, keepdims=True)
        y = (h - mean) * lax.rsqrt(var + EPS)
        y = y * p[1:2, :] + p[2:3, :]
        y = jnp.maximum(y, 0.0)                                # [TN*L, H]

        # Free sublane regroup (wrapper guarantees L % 8 == 0).
        y3 = y.reshape(tn, l, h_dim)                           # [TN, L, H]

        # Per-cluster masked max over L.  y3 >= 0 after ReLU, so multiplying
        # by the (0/1) mask is equivalent to masked_fill(..., 0) and avoids
        # building a bool select operand.
        if has_mask:
            ym = y3 * mask_ref[...][:, :, None]
        else:
            ym = y3
        g = jnp.max(ym, axis=1)                                # [TN, H]

        # Single full-block store: concat([y, broadcast(g)], axis=-1).
        # TODO(synk): if writeback is still exposed at 2H < 128 lanes, present
        # a lane-dense (TN, L*2H) out slab instead (needs an in-kernel
        # relayout; gate on a profile).
        out_ref[...] = jnp.concatenate(
            [y3, jnp.broadcast_to(g[:, None, :], (tn, l, h_dim))], axis=-1)

    return kernel


def cluster_layer(x, mask=None, w=None, b=None, gamma=None, beta=None,
                  mask_wo_fill=False):
    """x: [..., L, F] float32; mask: [..., L] (nonzero = valid) or None.

    Returns (out [..., L, 2H], g [..., H]); matches the PyTorch module's
    default (mask_wo_fill=False) forward.
    """
    if mask_wo_fill:
        # TODO(synk): mask_wo_fill=True branch not implemented (see note above).
        raise NotImplementedError("mask_wo_fill=True is not supported")

    *lead, L, F = x.shape
    H = w.shape[1]
    N = int(math.prod(lead)) if lead else 1

    xf = x.reshape(N, L, F).astype(jnp.float32)
    has_mask = mask is not None
    # Binarize the mask (nonzero = valid) so the in-kernel multiply exactly
    # matches masked_fill semantics even for non-0/1 float masks.
    mf = (mask.reshape(N, L) != 0).astype(jnp.float32) if has_mask else None

    # Pad L up to a multiple of 8 so the in-kernel regroup is a free retile.
    # Padded rows get mask = 0 so they never win the max.
    L_pad = _round_up(L, 8)
    if L_pad != L:
        xf = jnp.pad(xf, ((0, 0), (0, L_pad - L), (0, 0)))
        if not has_mask:
            mf = jnp.ones((N, L), jnp.float32)
            has_mask = True
        mf = jnp.pad(mf, ((0, 0), (0, L_pad - L)))

    # --- choose clusters per grid step (TN) ---------------------------------
    out_row_bytes = _round_up(2 * H, _LANE) * 4
    x_row_bytes = _round_up(F, _LANE) * 4
    # (1) ~2 MiB of output per step: amortizes per-step pipeline overhead on
    #     this write-bound kernel.
    tn = max(8, _round_up(_TARGET_OUT_BYTES // (L_pad * out_row_bytes), 8))
    # (2) bound the double-buffered tile footprint (v7x VMEM is 64 MiB).
    per_cluster = (2 * L_pad * (out_row_bytes + x_row_bytes)
                   + 2 * _round_up(L_pad, _LANE) * 4)
    tn = min(tn, max(8, (_VMEM_TILE_BUDGET // per_cluster) // 8 * 8))
    # (3) never exceed the problem size.
    tn = min(tn, _round_up(N, 8))
    # (4) if there is enough work for >= 4 decent steps, split into an even
    #     grid of >= 4 steps (2 v7x TensorCores x >= 2 pipelined steps each);
    #     this also bounds the N-padding waste to < ~N/4 clusters.
    min_step_clusters = max(8, _MIN_STEP_ROWS // L_pad)
    if N > tn and N >= 4 * min_step_clusters:
        steps = max(4, _cdiv(N, tn))
        steps += steps % 2
        tn = min(tn, max(8, _round_up(_cdiv(N, steps), 8)))
    n_pad = _round_up(N, tn)
    grid = n_pad // tn

    # --- prepare padded / flattened inputs ----------------------------------
    if n_pad != N:
        xf = jnp.pad(xf, ((0, n_pad - N), (0, 0), (0, 0)))
        if has_mask:
            mf = jnp.pad(mf, ((0, n_pad - N), (0, 0)))
    x2d = xf.reshape(n_pad * L_pad, F)

    w32 = w.astype(jnp.float32)
    # b / gamma / beta packed into one resident (3, H) tile.
    params = jnp.stack(
        [b.reshape(H), gamma.reshape(H), beta.reshape(H)]).astype(jnp.float32)

    # --- VMEM limit: actual double-buffered footprint + headroom ------------
    x_blk = tn * L_pad * x_row_bytes
    out_blk = tn * L_pad * out_row_bytes
    m_blk = tn * _round_up(L_pad, _LANE) * 4 if has_mask else 0
    w_blk = _round_up(F, 8) * _round_up(H, _LANE) * 4
    p_blk = 8 * _round_up(H, _LANE) * 4
    interm = 4 * tn * L_pad * _round_up(H, _LANE) * 4   # h / y / bcast-g temps
    vmem_limit = 2 * (x_blk + out_blk + m_blk + w_blk + p_blk) + interm
    vmem_limit = min(max(16 * 1024 * 1024, vmem_limit + 4 * 1024 * 1024),
                     100 * 1024 * 1024)

    in_specs = [pl.BlockSpec((tn * L_pad, F), lambda i: (i, 0))]  # x (flattened)
    inputs = [x2d]
    if has_mask:
        in_specs.append(pl.BlockSpec((tn, L_pad), lambda i: (i, 0)))  # mask
        inputs.append(mf)
    in_specs += [
        pl.BlockSpec((F, H), lambda i: (0, 0)),        # W (resident)
        pl.BlockSpec((3, H), lambda i: (0, 0)),        # packed b/gamma/beta
    ]
    inputs += [w32, params]

    # TODO(synk): an optional bf16 out dtype would ~halve HBM write traffic on
    # this write-bound kernel; kept f32 to preserve the module's numerics.
    out = pl.pallas_call(
        _make_cluster_kernel(has_mask),
        out_shape=jax.ShapeDtypeStruct((n_pad, L_pad, 2 * H), jnp.float32),
        grid_spec=pltpu.PrefetchScalarGridSpec(
            num_scalar_prefetch=0,
            grid=(grid,),
            in_specs=in_specs,
            out_specs=pl.BlockSpec((tn, L_pad, 2 * H), lambda i: (i, 0, 0)),
        ),
        compiler_params=pltpu.CompilerParams(
            dimension_semantics=("parallel",),
            vmem_limit_bytes=vmem_limit,
        ),
    )(*inputs)

    out = out[:N, :L]                    # drop cluster / L padding
    g = out[:, 0, H:2 * H]               # broadcast-g half is in every row
    return out.reshape(*lead, L, 2 * H), g.reshape(*lead, H)


def cluster_layer_ref(x, mask, w, b, gamma, beta):
    """Pure-JAX reference (mirrors the PyTorch forward, mask_wo_fill=False)."""
    h = jnp.einsum('...lf,fh->...lh', x, w) + b
    mean = h.mean(-1, keepdims=True)
    var = jnp.square(h - mean).mean(-1, keepdims=True)
    y = (h - mean) / jnp.sqrt(var + EPS) * gamma + beta
    y = jnp.maximum(y, 0.0)
    if mask is not None:
        y_masked = jnp.where(mask[..., None] != 0, y, 0.0)
    else:
        y_masked = y
    g = y_masked.max(axis=-2)
    out = jnp.concatenate(
        [y, jnp.broadcast_to(g[..., None, :], y.shape)], axis=-1)
    return out, g


if __name__ == "__main__":
    # Shapes consistent with the module: x = [B, C, L, F], mask = [B, C, L]
    B, C, L, F, H = 2, 4, 8, 16, 32  # in_size=16, hidden_size=32

    key = jax.random.PRNGKey(0)
    kx, km, kw, kb, kg, kbe, kx2, km2, kx3 = jax.random.split(key, 9)

    x = jax.random.normal(kx, (B, C, L, F), dtype=jnp.float32)
    mask = (jax.random.uniform(km, (B, C, L)) > 0.3).astype(jnp.float32)

    # Deterministic synthetic parameters (Linear + LayerNorm affine).
    w = jax.random.normal(kw, (F, H), dtype=jnp.float32) * (1.0 / math.sqrt(F))
    b = jax.random.normal(kb, (H,), dtype=jnp.float32) * 0.1
    gamma = 1.0 + 0.1 * jax.random.normal(kg, (H,), dtype=jnp.float32)
    beta = 0.1 * jax.random.normal(kbe, (H,), dtype=jnp.float32)

    # 1) [B, C, L, F] path with mask
    out, g = cluster_layer(x, mask, w, b, gamma, beta)
    out = jax.block_until_ready(out)
    g = jax.block_until_ready(g)
    out_ref, g_ref = cluster_layer_ref(x, mask, w, b, gamma, beta)
    assert out.shape == (B, C, L, 2 * H) and g.shape == (B, C, H)
    assert jnp.allclose(out, out_ref, atol=1e-5, rtol=1e-5)
    assert jnp.allclose(g, g_ref, atol=1e-5, rtol=1e-5)

    # 2) [N, L, F] path, N not a multiple of the block size (exercises padding)
    N2 = 3
    x2 = jax.random.normal(kx2, (N2, L, F), dtype=jnp.float32)
    mask2 = (jax.random.uniform(km2, (N2, L)) > 0.3).astype(jnp.float32)
    out2, g2 = cluster_layer(x2, mask2, w, b, gamma, beta)
    out2 = jax.block_until_ready(out2)
    g2 = jax.block_until_ready(g2)
    out2_ref, g2_ref = cluster_layer_ref(x2, mask2, w, b, gamma, beta)
    assert out2.shape == (N2, L, 2 * H) and g2.shape == (N2, H)
    assert jnp.allclose(out2, out2_ref, atol=1e-5, rtol=1e-5)
    assert jnp.allclose(g2, g2_ref, atol=1e-5, rtol=1e-5)

    # 3) larger [N, L, F] path, no mask (exercises the no-mask kernel and the
    #    multi-step / even-grid tiling path)
    N3 = 600
    x3 = jax.random.normal(kx3, (N3, L, F), dtype=jnp.float32)
    out3, g3 = cluster_layer(x3, None, w, b, gamma, beta)
    out3 = jax.block_until_ready(out3)
    g3 = jax.block_until_ready(g3)
    out3_ref, g3_ref = cluster_layer_ref(x3, None, w, b, gamma, beta)
    assert out3.shape == (N3, L, 2 * H) and g3.shape == (N3, H)
    assert jnp.allclose(out3, out3_ref, atol=1e-5, rtol=1e-5)
    assert jnp.allclose(g3, g3_ref, atol=1e-5, rtol=1e-5)

    print("KERNEL_OK")
</pallas_src>

<mosaic_0001>
module attributes {stable_mosaic.version = 11 : i64} {
  func.func @kernel(%arg0: i32, %arg1: memref<64x16xf32, #tpu.memory_space<vmem>>, %arg2: memref<8x8xf32, #tpu.memory_space<vmem>>, %arg3: memref<16x32xf32, #tpu.memory_space<vmem>>, %arg4: memref<3x32xf32, #tpu.memory_space<vmem>>, %arg5: memref<8x8x64xf32, #tpu.memory_space<vmem>>) attributes {dimension_semantics = [#tpu.dimension_semantics<parallel>], iteration_bounds = array<i64: 1>, scalar_prefetch = 0 : i64, scratch_operands = 0 : i64, tpu.core_type = #tpu.core_type<tc>, window_params = [{transform_indices = @transform_0, window_bounds = array<i64: 64, 16>}, {transform_indices = @transform_1, window_bounds = array<i64: 8, 8>}, {pipeline_mode = #tpu.pipeline_mode<synchronous>, transform_indices = @transform_2, window_bounds = array<i64: 16, 32>}, {pipeline_mode = #tpu.pipeline_mode<synchronous>, transform_indices = @transform_3, window_bounds = array<i64: 3, 32>}, {transform_indices = @transform_4, window_bounds = array<i64: 8, 8, 64>}]} {
    %c0 = arith.constant 0 : index
    %c0_0 = arith.constant 0 : index
    %0 = vector.load %arg1[%c0, %c0_0] : memref<64x16xf32, #tpu.memory_space<vmem>>, vector<64x16xf32>
    %c0_1 = arith.constant 0 : index
    %c0_2 = arith.constant 0 : index
    %1 = vector.load %arg3[%c0_1, %c0_2] : memref<16x32xf32, #tpu.memory_space<vmem>>, vector<16x32xf32>
    %cst = arith.constant dense<0.000000e+00> : vector<64x32xf32>
    %2 = tpu.matmul %0, %1, %cst {dimension_numbers = #tpu.dot_dimension_numbers<[1], [0], [0], [1], [0, 0, 1, 1], [], []>} : vector<64x16xf32>, vector<16x32xf32>, vector<64x32xf32> -> vector<64x32xf32>
    %c0_3 = arith.constant 0 : index
    %c0_4 = arith.constant 0 : index
    %3 = vector.load %arg4[%c0_3, %c0_4] : memref<3x32xf32, #tpu.memory_space<vmem>>, vector<3x32xf32>
    %4 = vector.extract_strided_slice %3 {offsets = [0, 0], sizes = [1, 32], strides = [1, 1]} : vector<3x32xf32> to vector<1x32xf32>
    %5 = vector.broadcast %4 : vector<1x32xf32> to vector<64x32xf32>
    %6 = arith.addf %2, %5 : vector<64x32xf32>
    %cst_5 = arith.constant dense<0.000000e+00> : vector<64xf32>
    %7 = vector.multi_reduction <add>, %6, %cst_5 [1] : vector<64x32xf32> to vector<64xf32>
    %8 = vector.shape_cast %7 : vector<64xf32> to vector<64x1xf32>
    %cst_6 = arith.constant 3.200000e+01 : f32
    %9 = vector.broadcast %cst_6 : f32 to vector<64x1xf32>
    %10 = arith.divf %8, %9 : vector<64x1xf32>
    %11 = vector.broadcast %10 : vector<64x1xf32> to vector<64x32xf32>
    %12 = arith.subf %6, %11 : vector<64x32xf32>
    %13 = arith.mulf %12, %12 : vector<64x32xf32>
    %cst_7 = arith.constant dense<0.000000e+00> : vector<64xf32>
    %14 = vector.multi_reduction <add>, %13, %cst_7 [1] : vector<64x32xf32> to vector<64xf32>
    %15 = vector.shape_cast %14 : vector<64xf32> to vector<64x1xf32>
    %cst_8 = arith.constant 3.200000e+01 : f32
    %16 = vector.broadcast %cst_8 : f32 to vector<64x1xf32>
    %17 = arith.divf %15, %16 : vector<64x1xf32>
    %18 = vector.broadcast %10 : vector<64x1xf32> to vector<64x32xf32>
    %19 = arith.subf %6, %18 : vector<64x32xf32>
    %cst_9 = arith.constant 9.99999974E-6 : f32
    %20 = vector.broadcast %cst_9 : f32 to vector<64x1xf32>
    %21 = arith.addf %17, %20 : vector<64x1xf32>
    %22 = math.rsqrt %21 : vector<64x1xf32>
    %23 = vector.broadcast %22 : vector<64x1xf32> to vector<64x32xf32>
    %24 = arith.mulf %19, %23 : vector<64x32xf32>
    %25 = vector.extract_strided_slice %3 {offsets = [1, 0], sizes = [1, 32], strides = [1, 1]} : vector<3x32xf32> to vector<1x32xf32>
    %26 = vector.broadcast %25 : vector<1x32xf32> to vector<64x32xf32>
    %27 = arith.mulf %24, %26 : vector<64x32xf32>
    %28 = vector.extract_strided_slice %3 {offsets = [2, 0], sizes = [1, 32], strides = [1, 1]} : vector<3x32xf32> to vector<1x32xf32>
    %29 = vector.broadcast %28 : vector<1x32xf32> to vector<64x32xf32>
    %30 = arith.addf %27, %29 : vector<64x32xf32>
    %cst_10 = arith.constant 0.000000e+00 : f32
    %31 = vector.broadcast %cst_10 : f32 to vector<64x32xf32>
    %32 = arith.maximumf %30, %31 : vector<64x32xf32>
    %33 = vector.shape_cast %32 : vector<64x32xf32> to vector<8x8x32xf32>
    %c0_11 = arith.constant 0 : index
    %c0_12 = arith.constant 0 : index
    %34 = vector.load %arg2[%c0_11, %c0_12] : memref<8x8xf32, #tpu.memory_space<vmem>>, vector<8x8xf32>
    %35 = vector.shape_cast %34 : vector<8x8xf32> to vector<8x8x1xf32>
    %36 = vector.broadcast %35 : vector<8x8x1xf32> to vector<8x8x32xf32>
    %37 = arith.mulf %33, %36 : vector<8x8x32xf32>
    %cst_13 = arith.constant dense<0xFF800000> : vector<8x32xf32>
    %38 = vector.multi_reduction <maximumf>, %37, %cst_13 [1] : vector<8x8x32xf32> to vector<8x32xf32>
    %39 = vector.shape_cast %38 : vector<8x32xf32> to vector<8x1x32xf32>
    %40 = vector.shape_cast %39 : vector<8x1x32xf32> to vector<8x1x32xf32>
    %41 = vector.broadcast %40 : vector<8x1x32xf32> to vector<8x8x32xf32>
    %42 = tpu.concatenate %33, %41 in 2 : vector<8x8x32xf32>, vector<8x8x32xf32> -> vector<8x8x64xf32>
    %c0_14 = arith.constant 0 : index
    %c0_15 = arith.constant 0 : index
    %c0_16 = arith.constant 0 : index
    %43 = vector.load %arg5[%c0_14, %c0_15, %c0_16] : memref<8x8x64xf32, #tpu.memory_space<vmem>>, vector<8x8x64xf32>
    tpu.vector_store %arg5[%c0_14, %c0_15, %c0_16], %42 {strides = array<i32>} : memref<8x8x64xf32, #tpu.memory_space<vmem>>, vector<8x8x64xf32>,
    return
  }
  func.func @transform_0(%arg0: i32) -> (i32, i32) {
    %c0_i32 = arith.constant 0 : i32
    %c0_i32_0 = arith.constant 0 : i32
    return %arg0, %c0_i32 : i32, i32
  }
  func.func @transform_1(%arg0: i32) -> (i32, i32) {
    %c0_i32 = arith.constant 0 : i32
    %c0_i32_0 = arith.constant 0 : i32
    return %arg0, %c0_i32 : i32, i32
  }
  func.func @transform_2(%arg0: i32) -> (i32, i32) {
    %c0_i32 = arith.constant 0 : i32
    %c0_i32_0 = arith.constant 0 : i32
    %c0_i32_1 = arith.constant 0 : i32
    return %c0_i32, %c0_i32_0 : i32, i32
  }
  func.func @transform_3(%arg0: i32) -> (i32, i32) {
    %c0_i32 = arith.constant 0 : i32
    %c0_i32_0 = arith.constant 0 : i32
    %c0_i32_1 = arith.constant 0 : i32
    return %c0_i32, %c0_i32_0 : i32, i32
  }
  func.func @transform_4(%arg0: i32) -> (i32, i32, i32) {
    %c0_i32 = arith.constant 0 : i32
    %c0_i32_0 = arith.constant 0 : i32
    %c0_i32_1 = arith.constant 0 : i32
    return %arg0, %c0_i32, %c0_i32_0 : i32, i32, i32
  }
}

</mosaic_0001>

<bundles_post_ra>
// kernel: tpu_custom_call.1
= control target key start
LH: loop header
LB: loop body
LE: loop exit
PB: predicated region body
PF: predicated region fallthrough
CT: control target
= control target key end

     0   :  { %vm33_vm0 = vcmask 130048   ;;  %s839_s0 = inlined_call_operand.vmem [shape: f32[64,16], index: 0, kind: input, shape index: {}]   ;;  %s840_s1 = inlined_call_operand.vmem [shape: f32[8,8], index: 1, kind: input, shape index: {}]   ;;  %s841_s2 = inlined_call_operand.vmem [shape: f32[16,32], index: 2, kind: input, shape index: {}]   ;;  %s842_s3 = inlined_call_operand.vmem [shape: f32[3,32], index: 3, kind: input, shape index: {}]   ;;  %s843_s4 = inlined_call_operand.hbm [shape: f32[8,8,64], index: 4, kind: output, shape index: {}]  }
   0x1   :  { %v26_v0 = vld [vmem:[%s841_s2] sm:$0xff]  ;;  %v27_v1 = vld [vmem:[%s841_s2 + $0x8] sm:$0xff] }
   0x2   :  { %v18_v2 = vld [vmem:[%s839_s0] sm:$0xff]  ;;  %v521_v3 = vpack.c.bf16 %v27_v1, %v26_v0 }
   0x3   :  { %509 = vmatprep.mubr.msk.f32.mxu0 %vm33_vm0, %v18_v2  ;;  %v22_v4 = vld [vmem:[%s839_s0 + $0x20] sm:$0xff] }
   0x4   :  { %515 = vmatprep.mubr.msk.f32.mxu1 %vm33_vm0, %v22_v4  ;;  %522 = vmatprep.subr.bf16.mxu0 %v521_v3 }
   0x5   :  { %525 = vmatprep.subr.bf16.mxu1 %v521_v3 }
   0x6   :  { %9 = vsyncpa [#allocation3], 0  ;;  %524 = vmatpush3.bf16.msra.mxu0 %v521_v3  ;;  %526 = vmatpush3.bf16.msra.mxu1 %v521_v3  ;;  %v19_v5 = vld [vmem:[%s839_s0 + $0x8] sm:$0xff]  ;;  %v20_v7 = vld [vmem:[%s839_s0 + $0x10] sm:$0xff]  ;;  %v29_v11 = vlaneseq  ;;  %vm163_vm1 = vcmask 261120   ;;  %vm462_vm2 = vcmask 523264  }
   0x7   :  { %v23_v6 = vld [vmem:[%s839_s0 + $0x28] sm:$0xff]  ;;  %v24_v8 = vld [vmem:[%s839_s0 + $0x30] sm:$0xff]  ;;  %v21_v9 = vld [vmem:[%s839_s0 + $0x18] sm:$0xff]  ;;  %s572_s10 = smov [#allocation2]  }
   0x8   :  { %v25_v10 = vld [vmem:[%s839_s0 + $0x38] sm:$0xff]  ;;  %v638_v12 = vshrl.u32 %v29_v11, 7  ;;  %v644_v14 = vld [vmem:[%s842_s3] sm:$0x7]  ;;  %s476_s11 = sshll.u32 %s572_s10, 4  ;;  %s477_s11 = int_to_ptr.vmem [resolvable:$true] %s476_s11 }
   0x9   :  { %510 = vmatmul.mubr.msk.f32.vlgmr.msra.gmra.mrb[0].mxu0 %vm33_vm0, %v19_v5  ;;  %516 = vmatmul.mubr.msk.f32.vlgmr.msra.gmra.mrb[0].mxu1 %vm33_vm0, %v23_v6  ;;  %s547_s12 = scalar_lea.vmem %s477_s11, 1024  ;;  %p552_p1 = scmp.lt.s32.totalorder %s477_s11, %s477_s11 }
   0xa   :  { %512 = vmatprep.mubr.msk.f32.mxu0 %vm33_vm0, %v20_v7  ;;  %518 = vmatprep.mubr.msk.f32.mxu1 %vm33_vm0, %v24_v8  ;;  %v31_v13 = vsub.s32 0, %v638_v12  ;;  %p548_p0 = scmp.ne.s32.totalorder %s477_s11, %s547_s12  ;;  %p553_p2 = scmp.lt.s32.totalorder %s547_s12, %s547_s12 }
   0xc   :  { %v32_v15 = vrot.slane %v644_v14, %v31_v13  ;;  %p554_p3 = por %p553_p2, %p552_p1 }
   0xd   :  { %513 = vmatmul.mubr.msk.f32.gmra.mrb[2].mxu0 %vm33_vm0, %v21_v9  ;;  %519 = vmatmul.mubr.msk.f32.gmra.mrb[2].mxu1 %vm33_vm0, %v25_v10 }
   0xe   :  { %p555_p4 = pnand %p554_p3, %p548_p0 }
  0xdc   :  { %v511_v16 = vpop.f32.mrb[0].mxu0  ;;  %v517_v17 = vpop.f32.mrb[0].mxu1 }
  0xdd   :  { %v130_v18 = vadd.f32 %v511_v16, %v32_v15  ;;  %v150_v19 = vadd.f32 %v517_v17, %v32_v15  ;;  %v124_v20 = vpop.f32.mrb[1].mxu0  ;;  %v144_v21 = vpop.f32.mrb[1].mxu1 }
  0xde   :  { %v125_v22 = vadd.f32 %v124_v20, %v32_v15  ;;  %v145_v31 = vadd.f32 %v144_v21, %v32_v15  ;;  %v301_v20 = vld [vmem:[%s840_s1] sm:$0xff]  ;;  %s571_s1 = smov 32  }
  0xdf   :  { %v179_v23 = vsel %vm163_vm1, %v150_v19, 0.0  ;;  %v167_v24 = vsel %vm163_vm1, %v130_v18, 0.0 }
  0xe0   :  { %180 = vadd.xlane.f32.xlu1 %v179_v23  ;;  %168 = vadd.xlane.f32.xlu0 %v167_v24  ;;  %v514_v25 = vpop.f32.mrb[2].mxu0  ;;  %v520_v26 = vpop.f32.mrb[2].mxu1  ;;  %v164_v33 = vsel %vm163_vm1, %v125_v22, 0.0  ;;  %v176_v37 = vsel %vm163_vm1, %v145_v31, 0.0  ;;  %v325_v24 = vsub.s32 3, %v638_v12 }
  0xe1   :  { %v140_v27 = vadd.f32 %v514_v25, %v32_v15  ;;  %v134_v28 = vpop.f32.mrb[3].mxu0  ;;  %v154_v29 = vpop.f32.mrb[3].mxu1  ;;  %v160_v34 = vadd.f32 %v520_v26, %v32_v15  ;;  %v339_v26 = vsub.s32 5, %v638_v12 }
  0xe2   :  { %v135_v30 = vadd.f32 %v134_v28, %v32_v15  ;;  %v155_v35 = vadd.f32 %v154_v29, %v32_v15  ;;  %v326_v25 = vrot.slane %v301_v20, %v325_v24  ;;  %v332_v28 = vsub.s32 4, %v638_v12 }
  0xe3   :  { %v173_v32 = vsel %vm163_vm1, %v140_v27, 0.0  ;;  %v185_v38 = vsel %vm163_vm1, %v160_v34, 0.0  ;;  %v340_v29 = vrot.slane %v301_v20, %v339_v26 }
  0xe4   :  { %174 = vadd.xlane.f32.xlu1 %v173_v32  ;;  %165 = vadd.xlane.f32.xlu0 %v164_v33  ;;  %v170_v36 = vsel %vm163_vm1, %v135_v30, 0.0  ;;  %v182_v39 = vsel %vm163_vm1, %v155_v35, 0.0  ;;  %v346_v32 = vsub.s32 6, %v638_v12 }
  0xe8   :  { %171 = vadd.xlane.f32.xlu1 %v170_v36  ;;  %177 = vadd.xlane.f32.xlu0 %v176_v37 }
  0xec   :  { %186 = vadd.xlane.f32.xlu1 %v185_v38  ;;  %183 = vadd.xlane.f32.xlu0 %v182_v39 }
 0x16d   :  { %v181_v40 = vpop.xlane.xlu1 %180  ;;  %v169_v41 = vpop.xlane.xlu0 %168 }
 0x16e   :  { %v194_v42 = vmul.f32 0.03125, %v181_v40  ;;  %v190_v43 = vmul.f32 0.03125, %v169_v41 }
 0x170   :  { %v657_v44 = vsub.f32 %v150_v19, %v194_v42  ;;  %v659_v45 = vsub.f32 %v130_v18, %v190_v43  ;;  %v271_v19 = vsub.s32 1, %v638_v12 }
 0x171   :  { %v175_v46 = vpop.xlane.xlu1 %174  ;;  %v166_v47 = vpop.xlane.xlu0 %165 }
 0x172   :  { %v192_v48 = vmul.f32 0.03125, %v175_v46  ;;  %v189_v49 = vmul.f32 0.03125, %v166_v47  ;;  %v206_v50 = vmul.f32 %v659_v45, %v659_v45  ;;  %v210_v54 = vmul.f32 %v657_v44, %v657_v44 }
 0x173   :  { %v312_v21 = vrot.slane %v301_v20, %v271_v19 }
 0x174   :  { %v663_v51 = vsub.f32 %v140_v27, %v192_v48  ;;  %v665_v52 = vsub.f32 %v125_v22, %v189_v49  ;;  %v216_v53 = vsel %vm163_vm1, %v206_v50, 0.0  ;;  %v228_v63 = vsel %vm163_vm1, %v210_v54, 0.0 }
 0x175   :  { %217 = vadd.xlane.f32.xlu1 %v216_v53  ;;  %v172_v55 = vpop.xlane.xlu1 %171  ;;  %v178_v56 = vpop.xlane.xlu0 %177  ;;  %v283_v22 = vsub.s32 2, %v638_v12  ;;  %v305_v27 = vrot.slane %v301_v20, %v31_v13 }
 0x176   :  { %v191_v57 = vmul.f32 0.03125, %v172_v55  ;;  %v193_v58 = vmul.f32 0.03125, %v178_v56  ;;  %v205_v59 = vmul.f32 %v665_v52, %v665_v52  ;;  %v208_v60 = vmul.f32 %v663_v51, %v663_v51 }
 0x177   :  { %v319_v23 = vrot.slane %v301_v20, %v283_v22  ;;  %v710_v56 = vrot.slane %v644_v14, %v271_v19 }
 0x178   :  { %v674_v61 = vsub.f32 %v135_v30, %v191_v57  ;;  %v676_v62 = vsub.f32 %v145_v31, %v193_v58  ;;  %v213_v0 = vsel %vm163_vm1, %v205_v59, 0.0  ;;  %v222_v6 = vsel %vm163_vm1, %v208_v60, 0.0 }
 0x179   :  { %229 = vadd.xlane.f32.xlu1 %v228_v63  ;;  %v187_v1 = vpop.xlane.xlu1 %186  ;;  %214 = vadd.xlane.f32.xlu0 %v213_v0  ;;  %v184_v2 = vpop.xlane.xlu0 %183  ;;  %v353_v30 = vsub.s32 7, %v638_v12  ;;  %v333_v31 = vrot.slane %v301_v20, %v332_v28  ;;  %v713_v60 = vrot.slane %v644_v14, %v283_v22 }
 0x17a   :  { %v196_v3 = vmul.f32 0.03125, %v187_v1  ;;  %v195_v4 = vmul.f32 0.03125, %v184_v2  ;;  %v209_v5 = vmul.f32 %v676_v62, %v676_v62  ;;  %v207_v10 = vmul.f32 %v674_v61, %v674_v61 }
 0x17b   :  { %v354_v33 = vrot.slane %v301_v20, %v353_v30 }
 0x17c   :  { %v683_v7 = vsub.f32 %v160_v34, %v196_v3  ;;  %v685_v8 = vsub.f32 %v155_v35, %v195_v4  ;;  %v225_v9 = vsel %vm163_vm1, %v209_v5, 0.0  ;;  %v219_v16 = vsel %vm163_vm1, %v207_v10, 0.0 }
 0x17d   :  { %223 = vadd.xlane.f32.xlu1 %v222_v6  ;;  %226 = vadd.xlane.f32.xlu0 %v225_v9  ;;  %v347_v34 = vrot.slane %v301_v20, %v346_v32 }
 0x17e   :  { %v212_v11 = vmul.f32 %v683_v7, %v683_v7  ;;  %v211_v17 = vmul.f32 %v685_v8, %v685_v8 }
 0x180   :  { %v234_v15 = vsel %vm163_vm1, %v212_v11, 0.0  ;;  %v231_v18 = vsel %vm163_vm1, %v211_v17, 0.0 }
 0x181   :  { %235 = vadd.xlane.f32.xlu1 %v234_v15  ;;  %220 = vadd.xlane.f32.xlu0 %v219_v16 }
 0x185   :  { %232 = vadd.xlane.f32.xlu0 %v231_v18 }
 0x192   :  { %314 = vbcast.lane.b32.xlu1 %v312_v21, 256 }
 0x196   :  { %321 = vbcast.lane.b32.xlu1 %v319_v23, 256 }
 0x19a   :  { %328 = vbcast.lane.b32.xlu1 %v326_v25, 256 }
 0x19b   :  { %307 = vbcast.lane.b32.xlu0 %v305_v27, 256 }
 0x19e   :  { %342 = vbcast.lane.b32.xlu1 %v340_v29, 256 }
 0x19f   :  { %335 = vbcast.lane.b32.xlu0 %v333_v31, 256 }
 0x1a2   :  { %356 = vbcast.lane.b32.xlu1 %v354_v33, 256 }
 0x1a3   :  { %349 = vbcast.lane.b32.xlu0 %v347_v34, 256 }
 0x202   :  { %v218_v35 = vpop.xlane.xlu1 %217 }
 0x203   :  { %v238_v36 = vmul.f32 0.03125, %v218_v35 }
 0x205   :  { %v246_v37 = vadd.f32 1e-05, %v238_v36 }
 0x206   :  { %v230_v13 = vpop.xlane.xlu1 %229  ;;  %v215_v38 = vpop.xlane.xlu0 %214 }
 0x207   :  { %531 = vrsqrt.f32 %v246_v37  ;;  %v242_v39 = vmul.f32 0.03125, %v230_v13  ;;  %v237_v40 = vmul.f32 0.03125, %v215_v38 }
 0x209   :  { %v250_v41 = vadd.f32 1e-05, %v242_v39  ;;  %v245_v42 = vadd.f32 1e-05, %v237_v40 }
 0x20a   :  { %v224_v43 = vpop.xlane.xlu1 %223  ;;  %v227_v46 = vpop.xlane.xlu0 %226 }
 0x20b   :  { %533 = vrsqrt.f32 %v250_v41  ;;  %v240_v12 = vmul.f32 0.03125, %v224_v43  ;;  %v241_v47 = vmul.f32 0.03125, %v227_v46 }
 0x20c   :  { %535 = vrsqrt.f32 %v245_v42 }
 0x20d   :  { %v248_v48 = vadd.f32 1e-05, %v240_v12  ;;  %v249_v49 = vadd.f32 1e-05, %v241_v47 }
 0x20e   :  { %v236_v50 = vpop.xlane.xlu1 %235  ;;  %v221_v53 = vpop.xlane.xlu0 %220 }
 0x20f   :  { %537 = vrsqrt.f32 %v248_v48  ;;  %v244_v54 = vmul.f32 0.03125, %v236_v50  ;;  %v239_v55 = vmul.f32 0.03125, %v221_v53 }
 0x210   :  { %539 = vrsqrt.f32 %v249_v49 }
 0x211   :  { %v532_v57 = vpop.eup %531  ;;  %v252_v58 = vadd.f32 1e-05, %v244_v54  ;;  %v247_v59 = vadd.f32 1e-05, %v239_v55 }
 0x212   :  { %v262_v63 = vmul.f32 %v532_v57, %v659_v45  ;;  %v315_v0 = vpop.permute.xlu1 %314  ;;  %v233_v1 = vpop.xlane.xlu0 %232 }
 0x213   :  { %541 = vrsqrt.f32 %v252_v58  ;;  %v243_v2 = vmul.f32 0.03125, %v233_v1 }
 0x214   :  { %543 = vrsqrt.f32 %v247_v59  ;;  %v274_v3 = vmul.f32 %v710_v56, %v262_v63 }
 0x215   :  { %v534_v4 = vpop.eup %533  ;;  %v251_v5 = vadd.f32 1e-05, %v243_v2 }
 0x216   :  { %v536_v6 = vpop.eup %535  ;;  %v718_v9 = vadd.f32 %v713_v60, %v274_v3  ;;  %v322_v10 = vpop.permute.xlu1 %321  ;;  %v266_v11 = vmul.f32 %v534_v4, %v657_v44 }
 0x217   :  { %545 = vrsqrt.f32 %v251_v5  ;;  %v261_v14 = vmul.f32 %v536_v6, %v665_v52  ;;  %v308_v52 = vpop.permute.xlu0 %307 }
 0x218   :  { %v294_v45 = vmax.f32 %v718_v9, 0.0  ;;  %v278_v15 = vmul.f32 %v710_v56, %v266_v11 }
 0x219   :  { %v538_v16 = vpop.eup %537  ;;  %v273_v17 = vmul.f32 %v710_v56, %v261_v14 }
 0x21a   :  { %v540_v18 = vpop.eup %539  ;;  %v359_v19 = vmul.f32 %v315_v0, %v294_v45  ;;  %v264_v20 = vmul.f32 %v538_v16, %v663_v51  ;;  %v329_v21 = vpop.permute.xlu1 %328  ;;  %v729_v22 = vadd.f32 %v713_v60, %v278_v15 }
 0x21b   :  { %v732_v44 = vadd.f32 %v713_v60, %v273_v17  ;;  %v265_v23 = vmul.f32 %v540_v18, %v676_v62  ;;  %v336_v42 = vpop.permute.xlu0 %335 }
 0x21c   :  { %v373_v24 = vsel %vm163_vm1, %v359_v19, -inf  ;;  %v276_v25 = vmul.f32 %v710_v56, %v264_v20  ;;  %v298_v26 = vmax.f32 %v729_v22, 0.0 }
 0x21d   :  { %v542_v27 = vpop.eup %541  ;;  %v374_v28 = vrot.slane %v373_v24, 4  ;;  %v293_v51 = vmax.f32 %v732_v44, 0.0  ;;  %v277_v29 = vmul.f32 %v710_v56, %v265_v23 }
 0x21e   :  { %v544_v30 = vpop.eup %543  ;;  %v741_v31 = vadd.f32 %v713_v60, %v276_v25  ;;  %v343_v32 = vpop.permute.xlu1 %342  ;;  %v268_v33 = vmul.f32 %v542_v27, %v683_v7 }
 0x21f   :  { %v375_v62 = vmax.f32 %v373_v24, %v374_v28  ;;  %v263_v34 = vmul.f32 %v544_v30, %v674_v61  ;;  %v358_v35 = vmul.f32 %v308_v52, %v293_v51  ;;  %v363_v36 = vmul.f32 %v343_v32, %v298_v26  ;;  %v350_v23 = vpop.permute.xlu0 %349 }
 0x220   :  { %v296_v37 = vmax.f32 %v741_v31, 0.0  ;;  %v751_v13 = vadd.f32 %v713_v60, %v277_v29  ;;  %v280_v38 = vmul.f32 %v710_v56, %v268_v33 }
 0x221   :  { %v546_v39 = vpop.eup %545  ;;  %v376_v40 = vrot.slane %v375_v62, 2  ;;  %v275_v7 = vmul.f32 %v710_v56, %v263_v34  ;;  %v366_v41 = vsel %vm163_vm1, %v358_v35, -inf  ;;  %v401_v61 = vsel %vm163_vm1, %v363_v36, -inf }
 0x222   :  { %v361_v43 = vmul.f32 %v329_v21, %v296_v37  ;;  %v367_v46 = vrot.slane %v366_v41, 4  ;;  %v402_v12 = vrot.slane %v401_v61, 4  ;;  %v297_v47 = vmax.f32 %v751_v13, 0.0  ;;  %v357_v59 = vpop.permute.xlu1 %356 }
 0x223   :  { %v377_v48 = vmax.f32 %v375_v62, %v376_v40  ;;  %v761_v49 = vadd.f32 %v713_v60, %v275_v7  ;;  %v764_v50 = vadd.f32 %v713_v60, %v280_v38  ;;  %v267_v53 = vmul.f32 %v546_v39, %v685_v8 }
 0x224   :  { %v387_v54 = vsel %vm163_vm1, %v361_v43, -inf  ;;  %v368_v55 = vmax.f32 %v366_v41, %v367_v46  ;;  %v403_v57 = vmax.f32 %v401_v61, %v402_v12  ;;  %v362_v58 = vmul.f32 %v336_v42, %v297_v47 }
 0x225   :  { %v295_v63 = vmax.f32 %v761_v49, 0.0  ;;  %v388_v0 = vrot.slane %v387_v54, 4  ;;  %v300_v1 = vmax.f32 %v764_v50, 0.0  ;;  %v378_v2 = vrot.slane %v377_v48, 1 }
 0x226   :  { %v369_v3 = vrot.slane %v368_v55, 2  ;;  %v404_v4 = vrot.slane %v403_v57, 2  ;;  %v394_v5 = vsel %vm163_vm1, %v362_v58, -inf  ;;  %v279_v8 = vmul.f32 %v710_v56, %v267_v53 }
 0x227   :  { %v360_v6 = vmul.f32 %v322_v10, %v295_v63  ;;  %v389_v11 = vmax.f32 %v387_v54, %v388_v0  ;;  %v395_v14 = vrot.slane %v394_v5, 4  ;;  %v365_v15 = vmul.f32 %v357_v59, %v300_v1 }
 0x228   :  { %v370_v16 = vmax.f32 %v368_v55, %v369_v3  ;;  %v405_v17 = vmax.f32 %v403_v57, %v404_v4  ;;  %v379_v18 = vmax.f32 %v377_v48, %v378_v2  ;;  %v779_v19 = vadd.f32 %v713_v60, %v279_v8 }
 0x229   :  { %v380_v20 = vsel %vm163_vm1, %v360_v6, -inf  ;;  %v390_v21 = vrot.slane %v389_v11, 2  ;;  %v396_v52 = vmax.f32 %v394_v5, %v395_v14  ;;  %v415_v56 = vsel %vm163_vm1, %v365_v15, -inf }
 0x22a   :  { %v381_v24 = vrot.slane %v380_v20, 4  ;;  %v416_v10 = vrot.slane %v415_v56, 4  ;;  %432 = vrot.lane.b32.xlu1 %v379_v18, %s571_s1  ;;  %v299_v25 = vmax.f32 %v779_v19, 0.0  ;;  %v371_v27 = vrot.slane %v370_v16, 1 }
 0x22b   :  { %v391_v28 = vmax.f32 %v389_v11, %v390_v21  ;;  %v397_v29 = vrot.slane %v396_v52, 2  ;;  %v406_v30 = vrot.slane %v405_v17, 1 }
 0x22c   :  { %v382_v60 = vmax.f32 %v380_v20, %v381_v24  ;;  %v417_v32 = vmax.f32 %v415_v56, %v416_v10  ;;  %v364_v33 = vmul.f32 %v350_v23, %v299_v25  ;;  %v372_v62 = vmax.f32 %v370_v16, %v371_v27 }
 0x22d   :  { %v398_v34 = vmax.f32 %v396_v52, %v397_v29  ;;  %v407_v35 = vmax.f32 %v405_v17, %v406_v30  ;;  %v392_v36 = vrot.slane %v391_v28, 1 }
 0x22e   :  { %v383_v38 = vrot.slane %v382_v60, 2  ;;  %v418_v39 = vrot.slane %v417_v32, 2  ;;  %v408_v40 = vsel %vm163_vm1, %v364_v33, -inf  ;;  %430 = vrot.lane.b32.xlu0 %v372_v62, %s571_s1 }
 0x22f   :  { %v409_v7 = vrot.slane %v408_v40, 4  ;;  %440 = vrot.lane.b32.xlu1 %v407_v35, %s571_s1  ;;  %v399_v41 = vrot.slane %v398_v34, 1  ;;  %v393_v61 = vmax.f32 %v391_v28, %v392_v36 }
 0x230   :  { %v384_v42 = vmax.f32 %v382_v60, %v383_v38  ;;  %v419_v43 = vmax.f32 %v417_v32, %v418_v39 }
 0x231   :  { %v410_v46 = vmax.f32 %v408_v40, %v409_v7  ;;  %v400_v12 = vmax.f32 %v398_v34, %v399_v41 }
 0x232   :  { %v385_v48 = vrot.slane %v384_v42, 1  ;;  %v420_v53 = vrot.slane %v419_v43, 1 }
 0x233   :  { %v411_v54 = vrot.slane %v410_v46, 2  ;;  %438 = vrot.lane.b32.xlu0 %v400_v12, %s571_s1  ;;  %436 = vrot.lane.b32.xlu1 %v393_v61, %s571_s1 }
 0x234   :  { %v386_v55 = vmax.f32 %v384_v42, %v385_v48  ;;  %v421_v57 = vmax.f32 %v419_v43, %v420_v53 }
 0x235   :  { %v412_v58 = vmax.f32 %v410_v46, %v411_v54 }
 0x237   :  { %434 = vrot.lane.b32.xlu0 %v386_v55, %s571_s1  ;;  %444 = vrot.lane.b32.xlu1 %v421_v57, %s571_s1  ;;  %v413_v59 = vrot.slane %v412_v58, 1 }
 0x239   :  { %v414_v0 = vmax.f32 %v412_v58, %v413_v59 }
 0x23b   :  { %442 = vrot.lane.b32.xlu0 %v414_v0, %s571_s1 }
 0x29c   :  { %v433_v2 = vpop.permute.xlu1 %432 }
 0x29d   :  { %v455_v3 = vsel %vm163_vm1, %v294_v45, %v433_v2 }
 0x29e   :  { %464 = vst.msk [vmem:[#allocation2 + $0x8] sm:$0xff] %vm462_vm2, %v455_v3 }
 0x2a0   :  { %v431_v4 = vpop.permute.xlu0 %430 }
 0x2a1   :  { %v454_v5 = vsel %vm163_vm1, %v293_v51, %v431_v4  ;;  %v441_v8 = vpop.permute.xlu1 %440 }
 0x2a2   :  { %463 = vst.msk [vmem:[#allocation2] sm:$0xff] %vm462_vm2, %v454_v5  ;;  %v459_v6 = vsel %vm163_vm1, %v298_v26, %v441_v8 }
 0x2a3   :  { %468 = vst.msk [vmem:[#allocation2 + $0x28] sm:$0xff] %vm462_vm2, %v459_v6 }
 0x2a5   :  { %v439_v11 = vpop.permute.xlu0 %438  ;;  %v437_v9 = vpop.permute.xlu1 %436 }
 0x2a6   :  { %v458_v45 = vsel %vm163_vm1, %v297_v47, %v439_v11  ;;  %v457_v44 = vsel %vm163_vm1, %v296_v37, %v437_v9 }
 0x2a7   :  { %467 = vst.msk [vmem:[#allocation2 + $0x20] sm:$0xff] %vm462_vm2, %v458_v45  ;;  %466 = vst.msk [vmem:[#allocation2 + $0x18] sm:$0xff] %vm462_vm2, %v457_v44 }
 0x2a9   :  { %v435_v51 = vpop.permute.xlu0 %434  ;;  %v445_v22 = vpop.permute.xlu1 %444 }
 0x2aa   :  { %v456_v26 = vsel %vm163_vm1, %v295_v63, %v435_v51  ;;  %v461_v13 = vsel %vm163_vm1, %v300_v1, %v445_v22 }
 0x2ab   :  { %465 = vst.msk [vmem:[#allocation2 + $0x10] sm:$0xff] %vm462_vm2, %v456_v26  ;;  %470 = vst.msk [vmem:[#allocation2 + $0x38] sm:$0xff] %vm462_vm2, %v461_v13 }
 0x2ad   :  { %v443_v31 = vpop.permute.xlu0 %442 }
 0x2ae   :  { %v460_v37 = vsel %vm163_vm1, %v299_v25, %v443_v31 }
 0x2af   :  { %469 = vst.msk [vmem:[#allocation2 + $0x30] sm:$0xff] %vm462_vm2, %v460_v37 }
 0x2b0   :  { %558 = shalt.err (!%p555_p4)
}
 0x2b1   :  { %s559_s15 = scalar_lea.hbm %s843_s4, 1024 }
 0x2b2   :  { %p560_p5 = scmp.ne.s32.totalorder %s843_s4, %s559_s15  ;;  %p563_p6 = scmp.lt.u32.totalorder %s559_s15, %s843_s4 }
 0x2b4   :  { %p565_p7 = pnand %p563_p6, %p560_p5 }
 0x2b6   :  { %568 = shalt.err (!%p565_p7)
}
 0x2b7   :  { %s573_s20 = smov 128   ;;  %s574_s21 = smov 8  }
 0x2b8   :  { %482 = dma.vmem_to_hbm [thread:$0]  %s477_s11, 1024, %s843_s4, [#allocation3], %s573_s20, %s573_s20, %s574_s21  }
 0x2b9   :  { %569 = dma.done.wait [#allocation3], 1024  }
 0x2ba   :  { %570 = vsyncadd [#allocation3], 4294966272 }
 0x2bb   :  { %486 = vsyncpa [#allocation3], 1 }

</bundles_post_ra>
